<compile_context>
chip_gen: v5e
topology: v5e:2x2
jax: 0.10.0
libtpu: 0.0.40
codegen_flags: <defaults>
</compile_context>

<pallas_src>
import functools

import jax
import jax.numpy as jnp
from jax.experimental import pallas as pl
from jax.experimental.pallas import tpu as pltpu


def _round_up(x, m):
    return (x + m - 1) // m * m


# ---------------------------------------------------------------------------
# Path 1: small tables resident in VMEM, gather via one-hot MXU contraction.
# ---------------------------------------------------------------------------
def _resident_gather_kernel(n_frozen, ids_ref, frozen_ref, unfrozen_ref, out_ref):
    """ids_ref: (tb, 1) int32 VMEM block; tables: whole arrays in VMEM."""
    ids = ids_ref[...]                                     # (tb, 1) int32
    tb = ids.shape[0]
    nf = frozen_ref.shape[0]
    nu = unfrozen_ref.shape[0]

    # Exactly one column is hot per valid token (out-of-range / padded rows are
    # all-zero for that table), so each dot selects a single table row.
    sel_f = (jax.lax.broadcasted_iota(jnp.int32, (tb, nf), 1) == ids)
    sel_u = (jax.lax.broadcasted_iota(jnp.int32, (tb, nu), 1) == (ids - n_frozen))

    acc = jnp.dot(sel_f.astype(frozen_ref.dtype), frozen_ref[...],
                  preferred_element_type=jnp.float32,
                  precision=jax.lax.Precision.HIGHEST)
    acc = acc + jnp.dot(sel_u.astype(unfrozen_ref.dtype), unfrozen_ref[...],
                        preferred_element_type=jnp.float32,
                        precision=jax.lax.Precision.HIGHEST)
    out_ref[...] = acc.astype(out_ref.dtype)


def _resident_forward(flat_idx, weight_frozen, weight_unfrozen, block_tokens):
    n_frozen, d = weight_frozen.shape
    n_unfrozen = weight_unfrozen.shape[0]
    n_tok = flat_idx.shape[0]

    # Sublane-dense token blocks; tiny inputs stay tiny.
    tb = max(8, min(_round_up(block_tokens, 8), _round_up(n_tok, 8)))
    padded = _round_up(n_tok, tb)
    ids = flat_idx
    if padded != n_tok:
        ids = jnp.pad(ids, (0, padded - n_tok))            # id 0 = valid frozen row
    ids2d = ids.reshape(padded, 1)
    num_blocks = padded // tb

    out = pl.pallas_call(
        functools.partial(_resident_gather_kernel, n_frozen),
        out_shape=jax.ShapeDtypeStruct((padded, d), weight_frozen.dtype),
        grid_spec=pl.GridSpec(
            grid=(num_blocks,),
            in_specs=[
                pl.BlockSpec((tb, 1), lambda i: (i, 0)),          # token ids
                pl.BlockSpec((n_frozen, d), lambda i: (0, 0)),    # whole frozen table
                pl.BlockSpec((n_unfrozen, d), lambda i: (0, 0)),  # whole unfrozen table
            ],
            out_specs=pl.BlockSpec((tb, d), lambda i: (i, 0)),
        ),
        compiler_params=pltpu.CompilerParams(
            dimension_semantics=("parallel",)),
    )(ids2d, weight_frozen, weight_unfrozen)
    return out[:n_tok]


# ---------------------------------------------------------------------------
# Path 2: large tables in HBM, one row DMA per token, sliding-window drain.
# ---------------------------------------------------------------------------
def _dma_gather_kernel(n_tok, tb, rem, num_blocks,
                       flags_ref, lids_ref, frozen_hbm, unfrozen_hbm,
                       out_hbm, sem):
    """flags/lids: SMEM int32[n_tok] (scalar prefetch); tables/out: raw HBM refs."""
    blk = pl.program_id(0)
    base = blk * tb

    def issue_one(t, carry):
        row = base + t

        @pl.when(row < n_tok)                 # tail-block guard: skip padded slots
        def _():
            lid = lids_ref[row]
            in_frozen = flags_ref[row]

            @pl.when(in_frozen == 1)
            def _():
                pltpu.make_async_copy(
                    frozen_hbm.at[pl.ds(lid, 1), :],
                    out_hbm.at[pl.ds(row, 1), :],
                    sem.at[0]).start()

            @pl.when(in_frozen == 0)
            def _():
                pltpu.make_async_copy(
                    unfrozen_hbm.at[pl.ds(lid, 1), :],
                    out_hbm.at[pl.ds(row, 1), :],
                    sem.at[0]).start()

        return carry

    # Issue every copy of this block BEFORE waiting on anything, so block blk-1
    # completion overlaps with block blk descriptor issue.  Unrolled so scalar
    # address math co-issues with descriptor pushes.
    jax.lax.fori_loop(0, tb, issue_one, 0, unroll=8)

    if num_blocks > 1:
        # Single byte-accumulating wait retiring the PREVIOUS block's tb row
        # copies (DMA semaphores count bytes; (tb, D) == tb rows of D elements).
        @pl.when(blk > 0)
        def _():
            pltpu.make_async_copy(out_hbm.at[pl.ds(0, tb), :],
                                  out_hbm.at[pl.ds(0, tb), :],
                                  sem.at[0]).wait()

    # Final drain: the last (possibly ragged) block issued exactly `rem` copies.
    @pl.when(blk == num_blocks - 1)
    def _():
        pltpu.make_async_copy(out_hbm.at[pl.ds(0, rem), :],
                              out_hbm.at[pl.ds(0, rem), :],
                              sem.at[0]).wait()


def _dma_gather_forward(flags, lids, weight_frozen, weight_unfrozen, block_tokens):
    n_frozen, d = weight_frozen.shape
    n_tok = flags.shape[0]

    tb = max(8, min(block_tokens, _round_up(n_tok, 8)))
    num_blocks = pl.cdiv(n_tok, tb)
    rem = n_tok - (num_blocks - 1) * tb       # valid rows in the final block

    return pl.pallas_call(
        functools.partial(_dma_gather_kernel, n_tok, tb, rem, num_blocks),
        out_shape=jax.ShapeDtypeStruct((n_tok, d), weight_frozen.dtype),
        grid_spec=pltpu.PrefetchScalarGridSpec(
            num_scalar_prefetch=2,                        # routing flags + local ids
            grid=(num_blocks,),
            in_specs=[
                pl.BlockSpec(memory_space=pl.ANY),        # frozen table (HBM)
                pl.BlockSpec(memory_space=pl.ANY),        # unfrozen table (HBM)
            ],
            out_specs=pl.BlockSpec(memory_space=pl.ANY),  # output rows (HBM DMA dst)
            scratch_shapes=[pltpu.SemaphoreType.DMA((1,))],
        ),
        # The sliding-window drain carries semaphore state across grid steps, so
        # the token-block axis must stay sequential.
        compiler_params=pltpu.CompilerParams(
            dimension_semantics=("arbitrary",)),
    )(flags, lids, weight_frozen, weight_unfrozen)


# ---------------------------------------------------------------------------
# Public wrapper == PartiallyFrozenEmbedding.forward
# ---------------------------------------------------------------------------
def partially_frozen_embedding(idx, weight_frozen, weight_unfrozen, *,
                               block_tokens=256,
                               resident_max_rows=2048,
                               resident_max_bytes=4 * 1024 * 1024,
                               force_dma_gather=False):
    n_frozen, d = weight_frozen.shape
    n_unfrozen, d2 = weight_unfrozen.shape
    assert d == d2, "frozen / unfrozen tables must share embed_dim"
    assert weight_frozen.dtype == weight_unfrozen.dtype
    assert n_frozen > 0 and n_unfrozen > 0

    flat_idx = idx.reshape(-1).astype(jnp.int32)

    itemsize = jnp.dtype(weight_frozen.dtype).itemsize
    table_bytes = (n_frozen + n_unfrozen) * d * itemsize
    use_resident = (not force_dma_gather
                    and (n_frozen + n_unfrozen) <= resident_max_rows
                    and table_bytes <= resident_max_bytes)

    if use_resident:
        out_flat = _resident_forward(flat_idx, weight_frozen, weight_unfrozen,
                                     block_tokens)
    else:
        # Routing precompute in the wrapper (vectorized, fused by XLA):
        # TODO(synk): F.embedding raises on out-of-range ids; here they clamp.
        in_frozen = flat_idx < n_frozen
        local_id = jnp.where(in_frozen,
                             jnp.clip(flat_idx, 0, n_frozen - 1),
                             jnp.clip(flat_idx - n_frozen, 0, n_unfrozen - 1))
        out_flat = _dma_gather_forward(in_frozen.astype(jnp.int32),
                                       local_id.astype(jnp.int32),
                                       weight_frozen, weight_unfrozen,
                                       block_tokens)

    return out_flat.reshape(idx.shape + (d,))


if __name__ == "__main__":
    key = jax.random.PRNGKey(0)
    k_frozen, k_unfrozen, k_idx, k_idx2 = jax.random.split(key, 4)

    n_frozen, n_unfrozen, embed_dim = 12, 4, 32
    vocab = n_frozen + n_unfrozen

    weight_frozen = jax.random.normal(k_frozen, (n_frozen, embed_dim), jnp.float32)
    weight_unfrozen = jax.random.normal(k_unfrozen, (n_unfrozen, embed_dim), jnp.float32)
    full_table = jnp.concatenate([weight_frozen, weight_unfrozen], axis=0)

    # --- Path 1: default dispatch -> small-table VMEM-resident fast path -----
    idx = jax.random.randint(k_idx, (2, 8), 0, vocab, dtype=jnp.int32)
    out = jax.block_until_ready(
        partially_frozen_embedding(idx, weight_frozen, weight_unfrozen))
    ref = jnp.take(full_table, idx, axis=0)
    assert out.shape == idx.shape + (embed_dim,)
    assert jnp.allclose(out, ref, rtol=1e-5, atol=1e-5), "resident path mismatch"

    # --- Path 2: forced HBM row-DMA gather (ragged last block exercised) -----
    idx2 = jax.random.randint(k_idx2, (3, 5), 0, vocab, dtype=jnp.int32)
    out2 = jax.block_until_ready(
        partially_frozen_embedding(idx2, weight_frozen, weight_unfrozen,
                                   block_tokens=8, force_dma_gather=True))
    ref2 = jnp.take(full_table, idx2, axis=0)
    assert out2.shape == idx2.shape + (embed_dim,)
    assert jnp.array_equal(out2, ref2), "DMA gather path mismatch"

    print("KERNEL_OK")
</pallas_src>

<mosaic_0001>
module attributes {stable_mosaic.version = 11 : i64} {
  func.func @_resident_gather_kernel(%arg0: i32, %arg1: memref<16x1xi32, #tpu.memory_space<vmem>>, %arg2: memref<12x32xf32, #tpu.memory_space<vmem>>, %arg3: memref<4x32xf32, #tpu.memory_space<vmem>>, %arg4: memref<16x32xf32, #tpu.memory_space<vmem>>) attributes {dimension_semantics = [#tpu.dimension_semantics<parallel>], iteration_bounds = array<i64: 1>, scalar_prefetch = 0 : i64, scratch_operands = 0 : i64, tpu.core_type = #tpu.core_type<tc>, window_params = [{transform_indices = @transform_0, window_bounds = array<i64: 16, 1>}, {pipeline_mode = #tpu.pipeline_mode<synchronous>, transform_indices = @transform_1, window_bounds = array<i64: 12, 32>}, {pipeline_mode = #tpu.pipeline_mode<synchronous>, transform_indices = @transform_2, window_bounds = array<i64: 4, 32>}, {transform_indices = @transform_3, window_bounds = array<i64: 16, 32>}]} {
    %c0 = arith.constant 0 : index
    %c0_0 = arith.constant 0 : index
    %0 = vector.load %arg1[%c0, %c0_0] : memref<16x1xi32, #tpu.memory_space<vmem>>, vector<16x1xi32>
    %1 = tpu.iota {dimensions = array<i32: 1>} : vector<16x12xi32>
    %2 = vector.broadcast %0 : vector<16x1xi32> to vector<16x12xi32>
    %3 = arith.cmpi eq, %1, %2 : vector<16x12xi32>
    %4 = tpu.iota {dimensions = array<i32: 1>} : vector<16x4xi32>
    %c12_i32 = arith.constant 12 : i32
    %5 = vector.broadcast %c12_i32 : i32 to vector<16x1xi32>
    %6 = arith.subi %0, %5 : vector<16x1xi32>
    %7 = vector.broadcast %6 : vector<16x1xi32> to vector<16x4xi32>
    %8 = arith.cmpi eq, %4, %7 : vector<16x4xi32>
    %9 = arith.extui %3 : vector<16x12xi1> to vector<16x12xi32>
    %10 = arith.sitofp %9 : vector<16x12xi32> to vector<16x12xf32>
    %c0_1 = arith.constant 0 : index
    %c0_2 = arith.constant 0 : index
    %11 = vector.load %arg2[%c0_1, %c0_2] : memref<12x32xf32, #tpu.memory_space<vmem>>, vector<12x32xf32>
    %cst = arith.constant dense<0.000000e+00> : vector<16x32xf32>
    %12 = tpu.matmul %10, %11, %cst {dimension_numbers = #tpu.dot_dimension_numbers<[1], [0], [0], [1], [0, 0, 1, 1], [], []>, precision = #tpu.contract_precision<fp32>} : vector<16x12xf32>, vector<12x32xf32>, vector<16x32xf32> -> vector<16x32xf32>
    %13 = arith.extui %8 : vector<16x4xi1> to vector<16x4xi32>
    %14 = arith.sitofp %13 : vector<16x4xi32> to vector<16x4xf32>
    %c0_3 = arith.constant 0 : index
    %c0_4 = arith.constant 0 : index
    %15 = vector.load %arg3[%c0_3, %c0_4] : memref<4x32xf32, #tpu.memory_space<vmem>>, vector<4x32xf32>
    %cst_5 = arith.constant dense<0.000000e+00> : vector<16x32xf32>
    %16 = tpu.matmul %14, %15, %cst_5 {dimension_numbers = #tpu.dot_dimension_numbers<[1], [0], [0], [1], [0, 0, 1, 1], [], []>, precision = #tpu.contract_precision<fp32>} : vector<16x4xf32>, vector<4x32xf32>, vector<16x32xf32> -> vector<16x32xf32>
    %17 = arith.addf %12, %16 : vector<16x32xf32>
    %c0_6 = arith.constant 0 : index
    %c0_7 = arith.constant 0 : index
    %18 = vector.load %arg4[%c0_6, %c0_7] : memref<16x32xf32, #tpu.memory_space<vmem>>, vector<16x32xf32>
    tpu.vector_store %arg4[%c0_6, %c0_7], %17 {strides = array<i32>} : memref<16x32xf32, #tpu.memory_space<vmem>>, vector<16x32xf32>,
    return
  }
  func.func @transform_0(%arg0: i32) -> (i32, i32) {
    %c0_i32 = arith.constant 0 : i32
    %c0_i32_0 = arith.constant 0 : i32
    return %arg0, %c0_i32 : i32, i32
  }
  func.func @transform_1(%arg0: i32) -> (i32, i32) {
    %c0_i32 = arith.constant 0 : i32
    %c0_i32_0 = arith.constant 0 : i32
    %c0_i32_1 = arith.constant 0 : i32
    return %c0_i32, %c0_i32_0 : i32, i32
  }
  func.func @transform_2(%arg0: i32) -> (i32, i32) {
    %c0_i32 = arith.constant 0 : i32
    %c0_i32_0 = arith.constant 0 : i32
    %c0_i32_1 = arith.constant 0 : i32
    return %c0_i32, %c0_i32_0 : i32, i32
  }
  func.func @transform_3(%arg0: i32) -> (i32, i32) {
    %c0_i32 = arith.constant 0 : i32
    %c0_i32_0 = arith.constant 0 : i32
    return %arg0, %c0_i32 : i32, i32
  }
}

</mosaic_0001>

<bundles_post_ra>
// kernel: tpu_custom_call.1
= control target key start
LH: loop header
LB: loop body
LE: loop exit
PB: predicated region body
PF: predicated region fallthrough
CT: control target
= control target key end

     0   :  { %8 = vsyncpa [#allocation3], 0  ;;  %s612_s0 = inlined_call_operand.vmem [shape: s32[16,1], index: 0, kind: input, shape index: {}]   ;;  %s613_s1 = inlined_call_operand.vmem [shape: f32[12,32], index: 1, kind: input, shape index: {}]   ;;  %s614_s2 = inlined_call_operand.hbm [shape: f32[4,32], index: 2, kind: input, shape index: {}]   ;;  %s615_s3 = inlined_call_operand.hbm [shape: f32[16,32], index: 3, kind: output, shape index: {}]  }
   0x1   :  { %9 = vsyncpa [#allocation4], 0  ;;  %s19_s14 = sshll.u32 %s614_s2, 4  ;;  %s550_s15 = smov [#allocation2]   ;;  %s20_s14 = int_to_ptr.hbm [resolvable:$true] %s19_s14 }
   0x2   :  { %s21_s16 = sshll.u32 %s550_s15, 4  ;;  %s22_s16 = int_to_ptr.vmem [resolvable:$true] %s21_s16 }
   0x3   :  { %24 = dma.hbm_to_vmem [thread:$0]  %s20_s14, 64, %s22_s16, [#allocation3]  }
   0x4   :  { %546 = dma.done.wait [#allocation3], 64  }
   0x5   :  { %547 = vsyncadd [#allocation3], 4294967232  ;;  %v551_v0 = vmov 0   ;;  %v29_v1 = vld [vmem:[%s612_s0] sm:$0xff]  ;;  %v30_v3 = vld [vmem:[%s612_s0 + $0x8] sm:$0xff]  ;;  %vm69_vm0 = vcmask 1043456   ;;  %v31_v25 = vlaneseq }
   0x6   :  { %496 = vset.pattern.permute.xlu0 %v551_v0  ;;  %497 = vset.pattern.permute.xlu1 %v551_v0  ;;  %v472_v2 = vadd.s32 4294967284, %v29_v1  ;;  %v473_v4 = vadd.s32 4294967284, %v30_v3  ;;  %v61_v5 = vld [vmem:[#allocation2] sm:$0xf]  ;;  %v56_v12 = vld [vmem:[%s613_s1 + $0x8] sm:$0xf] }
   0x7   :  { %34 = vperm.xlu1 %497, %v29_v1   ;;  %v71_v6 = vsel %vm69_vm0, %v61_v5, 0  ;;  %v258_v13 = vsel %vm69_vm0, %v56_v12, 0  ;;  %v55_v16 = vld [vmem:[%s613_s1] sm:$0xff]  ;;  %v32_v26 = vand.u32 127, %v31_v25  ;;  %vm62_vm2 = vcmask 31744   ;;  %s553_s1 = smov [#allocation5]  }
   0x8   :  { %44 = vperm.xlu0 %496, %v472_v2   ;;  %v88_v7 = vand.u32 4294901760, %v71_v6  ;;  %v274_v14 = vand.u32 4294901760, %v258_v13  ;;  %v276_v17 = vand.u32 4294901760, %v55_v16  ;;  %vm250_vm3 = vcmask 97280   ;;  %s457_s23 = sshll.u32 %s553_s1, 4  ;;  %s459_s26 = sshll.u32 %s615_s3, 4  ;;  %s458_s23 = int_to_ptr.vmem [resolvable:$true] %s457_s23  ;;  %s460_s26 = int_to_ptr.hbm [resolvable:$true] %s459_s26 }
   0x9   :  { %v552_v29 = vmov 0.0   ;;  %vm450_vm7 = vcmask 261120   ;;  %s554_s27 = smov 128   ;;  %s555_s28 = smov 8  }
   0xa   :  { %v123_v8 = vsub.f32 %v71_v6, %v88_v7  ;;  %182 = vmatpush.msra.mxu3 %v88_v7  ;;  %89 = vmatpush.msra.mxu0 %v88_v7  ;;  %v310_v15 = vsub.f32 %v258_v13, %v274_v14  ;;  %v316_v19 = vsub.f32 %v55_v16, %v276_v17 }
   0xc   :  { %v124_v9 = vand.u32 4294901760, %v123_v8  ;;  %154 = vmatpush.msra.mxu2 %v123_v8  ;;  %v311_v18 = vand.u32 4294901760, %v310_v15  ;;  %v317_v21 = vand.u32 4294901760, %v316_v19 }
   0xe   :  { %v125_v10 = vsub.f32 %v123_v8, %v124_v9  ;;  %214 = vmatpush.msrb.mxu0 %v124_v9  ;;  %275 = vmatpush.msrb.mxu2 %v274_v14  ;;  %v312_v20 = vsub.f32 %v310_v15, %v311_v18  ;;  %v318_v23 = vsub.f32 %v316_v19, %v317_v21 }
   0xf   :  { %37 = vperm.xlu1 %497, %v30_v3  }
  0x10   :  { %47 = vperm.xlu0 %496, %v473_v4   ;;  %v126_v11 = vand.u32 4294901760, %v125_v10  ;;  %277 = vmatpush.msrb.mxu2 %v276_v17  ;;  %v313_v22 = vand.u32 4294901760, %v312_v20  ;;  %v319_v24 = vand.u32 4294901760, %v318_v23 }
  0x12   :  { %127 = vmatpush.msra.mxu1 %v126_v11  ;;  %314 = vmatpush.msrb.mxu3 %v313_v22 }
  0x14   :  { %240 = vmatpush.msrb.mxu1 %v88_v7  ;;  %320 = vmatpush.msrb.mxu3 %v319_v24 }
  0x79   :  { %v35_v27 = vpop.permute.xlu1 %34 }
  0x7a   :  { %vm39_vm1 = vcmp.eq.s32.totalorder %v32_v26, %v35_v27  ;;  %v45_v28 = vpop.permute.xlu0 %44 }
  0x7b   :  { %v474_v30 = vsel %vm39_vm1, 1.0, %v552_v29  ;;  %vm49_vm4 = vcmp.eq.s32.totalorder %v32_v26, %v45_v28 }
  0x7c   :  { %v476_v31 = vsel %vm49_vm4, 1.0, %v552_v29  ;;  %v252_v32 = vsel %vm250_vm3, %v474_v30, 0 }
  0x7d   :  { %478 = vmatmul.msk.f32.vlgmr.msra.gmra.mxu1 %vm62_vm2, %v476_v31  ;;  %v64_v33 = vsel %vm62_vm2, %v476_v31, 0  ;;  %v279_v35 = vsub.f32 %v252_v32, %v252_v32 }
  0x7e   :  { %v91_v34 = vsub.f32 %v64_v33, %v64_v33  ;;  %376 = vmatpush.msra.mxu1 %v274_v14 }
  0x7f   :  { %v280_v43 = vand.u32 4294901760, %v279_v35 }
  0x80   :  { %157 = vmatmul.f32.vlgmr.msra.gmra.mxu2 %v91_v34  ;;  %v92_v36 = vand.u32 4294901760, %v91_v34  ;;  %378 = vmatpush.msra.mxu1 %v276_v17 }
  0x81   :  { %v38_v37 = vpop.permute.xlu1 %37  ;;  %409 = vmatpush.msra.mxu2 %v311_v18  ;;  %v281_v48 = vsub.f32 %v279_v35, %v280_v43 }
  0x82   :  { %vm40_vm5 = vcmp.eq.s32.totalorder %v32_v26, %v38_v37  ;;  %186 = vmatmul.f32.vlgmr.msra.gmra.mxu3 %v92_v36  ;;  %v48_v38 = vpop.permute.xlu0 %47  ;;  %v93_v39 = vsub.f32 %v91_v34, %v92_v36 }
  0x83   :  { %vm50_vm6 = vcmp.eq.s32.totalorder %v32_v26, %v48_v38  ;;  %438 = vmatpush.msra.mxu3 %v274_v14  ;;  %413 = vmatpush.msra.mxu2 %v317_v21  ;;  %v475_v41 = vsel %vm40_vm5, 1.0, %v552_v29  ;;  %v282_v52 = vand.u32 4294901760, %v281_v48 }
  0x84   :  { %v477_v40 = vsel %vm50_vm6, 1.0, %v552_v29  ;;  %v94_v42 = vand.u32 4294901760, %v93_v39  ;;  %v255_v46 = vsel %vm250_vm3, %v475_v41, 0 }
  0x85   :  { %479 = vmatmul.msk.f32.gmra.mxu1 %vm62_vm2, %v477_v40  ;;  %v67_v44 = vsel %vm62_vm2, %v477_v40, 0  ;;  %440 = vmatpush.msra.mxu3 %v276_v17  ;;  %v287_v49 = vsub.f32 %v255_v46, %v255_v46 }
  0x86   :  { %95 = vmatmul.f32.vlgmr.msra.gmra.mxu0 %v94_v42  ;;  %v99_v45 = vsub.f32 %v67_v44, %v67_v44 }
  0x87   :  { %346 = vmatpush.msra.mxu0 %v310_v15  ;;  %v288_v53 = vand.u32 4294901760, %v287_v49 }
  0x88   :  { %162 = vmatmul.f32.gmra.mxu2 %v99_v45  ;;  %v100_v47 = vand.u32 4294901760, %v99_v45 }
  0x89   :  { %349 = vmatpush.msra.mxu0 %v316_v19  ;;  %v289_v54 = vsub.f32 %v287_v49, %v288_v53 }
  0x8a   :  { %192 = vmatmul.f32.gmra.mxu3 %v100_v47  ;;  %v101_v50 = vsub.f32 %v99_v45, %v100_v47 }
  0x8b   :  { %v290_v55 = vand.u32 4294901760, %v289_v54 }
  0x8c   :  { %v102_v51 = vand.u32 4294901760, %v101_v50 }
  0x8d   :  { %482 = vmatmul.msk.f32.vlgmr.msrb.gmra.mxu1 %vm62_vm2, %v476_v31 }
  0x8e   :  { %103 = vmatmul.f32.gmra.mxu0 %v102_v51 }
  0x90   :  { %283 = vmatmul.f32.vlgmr.msrb.gmra.mxu2 %v282_v52 }
  0x92   :  { %484 = vmatmul.msk.f32.vlgmr.msrb.gmra.mxu3 %vm250_vm3, %v474_v30 }
  0x95   :  { %483 = vmatmul.msk.f32.gmra.mxu1 %vm62_vm2, %v477_v40 }
  0x96   :  { %480 = vmatmul.msk.f32.vlgmr.msrb.gmra.mxu0 %vm62_vm2, %v476_v31 }
  0x98   :  { %291 = vmatmul.f32.gmra.mxu2 %v290_v55 }
  0x9a   :  { %485 = vmatmul.msk.f32.gmra.mxu3 %vm250_vm3, %v475_v41 }
  0x9d   :  { %382 = vmatmul.f32.vlgmr.msra.gmra.mxu1 %v280_v43 }
  0x9e   :  { %481 = vmatmul.msk.f32.gmra.mxu0 %vm62_vm2, %v477_v40 }
  0xa0   :  { %486 = vmatmul.msk.f32.vlgmr.msra.gmra.mxu2 %vm250_vm3, %v474_v30 }
  0xa2   :  { %488 = vmatmul.msk.f32.vlgmr.msra.gmra.mxu3 %vm250_vm3, %v474_v30 }
  0xa5   :  { %388 = vmatmul.f32.gmra.mxu1 %v288_v53 }
  0xa6   :  { %352 = vmatmul.f32.vlgmr.msra.gmra.mxu0 %v279_v35 }
  0xa8   :  { %487 = vmatmul.msk.f32.gmra.mxu2 %vm250_vm3, %v475_v41 }
  0xaa   :  { %489 = vmatmul.msk.f32.gmra.mxu3 %vm250_vm3, %v475_v41 }
  0xae   :  { %357 = vmatmul.f32.gmra.mxu0 %v287_v49 }
  0xfa   :  { %v130_v56 = vpop.f32.mrf.mxu1 }
 0x102   :  { %v134_v59 = vpop.f32.mrf.mxu1 }
 0x103   :  { %v96_v57 = vpop.f32.mrf.mxu0  ;;  %v158_v58 = vpop.f32.mrf.mxu2 }
 0x104   :  { %v131_v63 = vadd.f32 %v130_v56, %v96_v57 }
 0x105   :  { %v187_v60 = vpop.f32.mrf.mxu3 }
 0x106   :  { %v159_v2 = vadd.f32 %v158_v58, %v131_v63 }
 0x108   :  { %v188_v5 = vadd.f32 %v187_v60, %v159_v2 }
 0x10a   :  { %v243_v1 = vpop.f32.mrf.mxu1 }
 0x10b   :  { %v104_v61 = vpop.f32.mrf.mxu0  ;;  %v163_v62 = vpop.f32.mrf.mxu2 }
 0x10c   :  { %v135_v6 = vadd.f32 %v134_v59, %v104_v61 }
 0x10d   :  { %v193_v0 = vpop.f32.mrf.mxu3 }
 0x10e   :  { %v164_v9 = vadd.f32 %v163_v62, %v135_v6 }
 0x110   :  { %v194_v14 = vadd.f32 %v193_v0, %v164_v9 }
 0x112   :  { %v247_v10 = vpop.f32.mrf.mxu1 }
 0x113   :  { %v217_v3 = vpop.f32.mrf.mxu0  ;;  %v284_v4 = vpop.f32.mrf.mxu2 }
 0x114   :  { %v218_v8 = vadd.f32 %v217_v3, %v188_v5 }
 0x115   :  { %v323_v7 = vpop.f32.mrf.mxu3 }
 0x116   :  { %v244_v11 = vadd.f32 %v243_v1, %v218_v8 }
 0x118   :  { %v285_v16 = vadd.f32 %v284_v4, %v244_v11 }
 0x11a   :  { %v324_v18 = vadd.f32 %v323_v7, %v285_v16  ;;  %v383_v20 = vpop.f32.mrf.mxu1 }
 0x11b   :  { %v221_v12 = vpop.f32.mrf.mxu0  ;;  %v292_v13 = vpop.f32.mrf.mxu2 }
 0x11c   :  { %v222_v17 = vadd.f32 %v221_v12, %v194_v14 }
 0x11d   :  { %v327_v15 = vpop.f32.mrf.mxu3 }
 0x11e   :  { %v248_v19 = vadd.f32 %v247_v10, %v222_v17 }
 0x120   :  { %v293_v24 = vadd.f32 %v292_v13, %v248_v19 }
 0x122   :  { %v328_v28 = vadd.f32 %v327_v15, %v293_v24  ;;  %v389_v32 = vpop.f32.mrf.mxu1 }
 0x123   :  { %v353_v21 = vpop.f32.mrf.mxu0  ;;  %v416_v23 = vpop.f32.mrf.mxu2 }
 0x124   :  { %v354_v22 = vadd.f32 %v353_v21, %v324_v18 }
 0x125   :  { %v443_v26 = vpop.f32.mrf.mxu3 }
 0x126   :  { %v384_v25 = vadd.f32 %v383_v20, %v354_v22 }
 0x128   :  { %v417_v27 = vadd.f32 %v416_v23, %v384_v25 }
 0x12a   :  { %v444_v29 = vadd.f32 %v443_v26, %v417_v27 }
 0x12b   :  { %v358_v30 = vpop.f32.mrf.mxu0  ;;  %v420_v34 = vpop.f32.mrf.mxu2 }
 0x12c   :  { %451 = vst.msk [vmem:[#allocation5] sm:$0xff] %vm450_vm7, %v444_v29  ;;  %v359_v31 = vadd.f32 %v358_v30, %v328_v28 }
 0x12d   :  { %v447_v36 = vpop.f32.mrf.mxu3 }
 0x12e   :  { %v390_v33 = vadd.f32 %v389_v32, %v359_v31 }
 0x130   :  { %v421_v35 = vadd.f32 %v420_v34, %v390_v33 }
 0x132   :  { %v448_v37 = vadd.f32 %v447_v36, %v421_v35 }
 0x134   :  { %452 = vst.msk [vmem:[#allocation5 + $0x8] sm:$0xff] %vm450_vm7, %v448_v37 }
 0x135   :  { %465 = dma.vmem_to_hbm [thread:$0]  %s458_s23, 256, %s460_s26, [#allocation4], %s554_s27, %s554_s27, %s555_s28  }
 0x136   :  { %548 = dma.done.wait [#allocation4], 256  }
 0x137   :  { %549 = vsyncadd [#allocation4], 4294967040 }
 0x138   :  { %470 = vsyncpa [#allocation3], 1 }
 0x139   :  { %471 = vsyncpa [#allocation4], 1 }

</bundles_post_ra>
